<compile_context>
chip_gen: v7x
topology: tpu7x:2x2x1
jax: 0.10.0
libtpu: 0.0.40
codegen_flags: <defaults>
</compile_context>

<pallas_src>
import jax
import jax.numpy as jnp
from jax.experimental import pallas as pl
from jax.experimental.pallas import tpu as pltpu

IN_FEATURES = 30 * 30      # 900 (Flatten of [1, 30, 30])
HIDDEN = 512
OUT_FEATURES = 10
N_PAD = 128                # output lanes padded to one full vreg lane width
NEG_BIG = -1e30            # f32 bias for padded logit columns (exp -> 0)


def mlp1_kernel(x_ref, w1_ref, b1_ref, w2_ref, b2_ref, out_ref):
    # x_ref:  [tb, 900] f32      w1_ref: [900, 512] bf16   b1_ref: [1, 512] f32
    # w2_ref: [512, 128] bf16    b2_ref: [1, 128] f32      out_ref: [tb, 128] f32
    x = x_ref[...].astype(jnp.bfloat16)          # cast in-kernel (no extra HBM pass)

    # Hidden layer: bf16 MXU matmul, f32 accumulation, f32 bias + ReLU.
    h = jnp.dot(x, w1_ref[...], preferred_element_type=jnp.float32) + b1_ref[...]
    h = jnp.maximum(h, 0.0)

    # Output layer. Padded columns: zero weights + bias -1e30 -> effectively masked.
    logits = jnp.dot(h.astype(jnp.bfloat16), w2_ref[...],
                     preferred_element_type=jnp.float32) + b2_ref[...]

    # Numerically stable LogSoftmax over the 128-lane axis (f32 throughout).
    # exp/log hit the EUP and the lane max/sum hit the XLU -- free filler slots.
    m = jnp.max(logits, axis=-1, keepdims=True)
    z = logits - m
    lse = jnp.log(jnp.sum(jnp.exp(z), axis=-1, keepdims=True))
    out_ref[...] = z - lse


def _round_up(x, m):
    return ((x + m - 1) // m) * m


def _cdiv(a, b):
    return (a + b - 1) // b


def prepare_params(w1, b1, w2, b2):
    """One-time parameter prep (hoisted out of the forward pass).

    Weights -> bf16 for native MXU rate.  Output width padded 10 -> 128 with zero
    weight columns and -1e30 (f32) bias columns so the 128-lane log-softmax ignores
    them.  Biases stay f32.
    """
    assert w1.shape == (IN_FEATURES, HIDDEN)
    assert w2.shape == (HIDDEN, OUT_FEATURES)
    w1_p = w1.astype(jnp.bfloat16)                                      # [900, 512]
    b1_p = b1.reshape(1, HIDDEN).astype(jnp.float32)                    # [1, 512]
    w2_p = jnp.pad(w2, ((0, 0), (0, N_PAD - OUT_FEATURES))).astype(jnp.bfloat16)
    b2_p = jnp.pad(b2.reshape(1, OUT_FEATURES),
                   ((0, 0), (0, N_PAD - OUT_FEATURES)),
                   constant_values=NEG_BIG).astype(jnp.float32)          # [1, 128]
    return w1_p, b1_p, w2_p, b2_p


def mlp1_forward(x_nchw, params, *, block_b=1024):
    """x_nchw: [B, 1, 30, 30] float32 -> log-probs [B, 10] float32."""
    w1_p, b1_p, w2_p, b2_p = params
    B = x_nchw.shape[0]
    x_flat = x_nchw.reshape(B, IN_FEATURES).astype(jnp.float32)  # free reshape only

    # Batch tile: multiple of 8 (sublane). On v7x ensure >= 2 grid steps when the
    # batch allows it so the "parallel" axis shards across both TensorCores.
    tb = min(block_b, _round_up(B, 8))
    if B > 8 and _cdiv(B, tb) < 2:
        tb = _round_up(_cdiv(B, 2), 8)
    grid = (_cdiv(B, tb),)   # ragged last block handled by Pallas (masked writeback)

    # VMEM budget: double-buffered x/out tiles + resident weights + hidden
    # activations, with ~2x headroom. Never request the whole core (64 MiB on v7x).
    footprint = (2 * tb * IN_FEATURES * 4        # x tiles, f32, double-buffered
                 + 2 * tb * N_PAD * 4            # out tiles, f32, double-buffered
                 + tb * HIDDEN * 4               # hidden activations
                 + w1_p.size * 2 + w2_p.size * 2 # bf16 weights
                 + (b1_p.size + b2_p.size) * 4)  # f32 biases
    vmem_limit = int(min(48 * 1024 * 1024, max(16 * 1024 * 1024, 2 * footprint)))

    out = pl.pallas_call(
        mlp1_kernel,
        out_shape=jax.ShapeDtypeStruct((B, N_PAD), jnp.float32),
        grid_spec=pltpu.PrefetchScalarGridSpec(
            num_scalar_prefetch=0,
            grid=grid,
            in_specs=[
                # x tiles stream over the batch axis (pipelined DMA). Last dim 900
                # equals the full array dim, so no (8,128) violation and no K pad.
                pl.BlockSpec((tb, IN_FEATURES), lambda i: (i, 0)),
                # Weights/biases: constant index_map -> single DMA, VMEM-resident.
                pl.BlockSpec((IN_FEATURES, HIDDEN), lambda i: (0, 0)),
                pl.BlockSpec((1, HIDDEN), lambda i: (0, 0)),
                pl.BlockSpec((HIDDEN, N_PAD), lambda i: (0, 0)),
                pl.BlockSpec((1, N_PAD), lambda i: (0, 0)),
            ],
            out_specs=pl.BlockSpec((tb, N_PAD), lambda i: (i, 0)),
        ),
        compiler_params=pltpu.CompilerParams(
            dimension_semantics=("parallel",),
            vmem_limit_bytes=vmem_limit,
        ),
    )(x_flat, w1_p, b1_p, w2_p, b2_p)

    # Strip the 118 padded logit lanes (batch was never padded).
    return out[:, :OUT_FEATURES]


def init_params(key):
    """Deterministic parameter init (uniform, PyTorch-Linear-style bounds), f32."""
    k1, k2, k3, k4 = jax.random.split(key, 4)
    bound1 = 1.0 / jnp.sqrt(IN_FEATURES)
    bound2 = 1.0 / jnp.sqrt(HIDDEN)
    # Stored as [in, out] (transposed vs. PyTorch's [out, in]) for x @ W.
    w1 = jax.random.uniform(k1, (IN_FEATURES, HIDDEN), jnp.float32, -bound1, bound1)
    b1 = jax.random.uniform(k2, (HIDDEN,), jnp.float32, -bound1, bound1)
    w2 = jax.random.uniform(k3, (HIDDEN, OUT_FEATURES), jnp.float32, -bound2, bound2)
    b2 = jax.random.uniform(k4, (OUT_FEATURES,), jnp.float32, -bound2, bound2)
    return w1, b1, w2, b2


def reference_forward(x_nchw, w1, b1, w2, b2):
    """Pure-JAX f32 reference for correctness checking."""
    x = x_nchw.reshape(x_nchw.shape[0], -1)
    h = jnp.maximum(x @ w1 + b1.reshape(1, -1), 0.0)
    logits = h @ w2 + b2.reshape(1, -1)
    return jax.nn.log_softmax(logits, axis=1)


if __name__ == "__main__":
    key = jax.random.PRNGKey(0)
    kx, kp = jax.random.split(key)

    # Small batch, NCHW input consistent with Flatten(900) -> [B, 1, 30, 30].
    x = jax.random.normal(kx, (8, 1, 30, 30), dtype=jnp.float32)
    w1, b1, w2, b2 = init_params(kp)

    params = prepare_params(w1, b1, w2, b2)        # one-time prep, reused per call
    log_probs = mlp1_forward(x, params)
    log_probs = jax.block_until_ready(log_probs)

    ref = reference_forward(x, w1, b1, w2, b2)
    assert log_probs.shape == (8, 10)
    # bf16 MXU operands (f32 accumulation): compare against the f32 reference at a
    # correspondingly relaxed tolerance.
    assert jnp.allclose(log_probs, ref, atol=5e-2, rtol=5e-2), "mismatch vs reference"
    # Rows of log-probs must exponentiate-sum to 1 (softmax itself is exact f32).
    assert jnp.allclose(jnp.sum(jnp.exp(log_probs), axis=1), 1.0, atol=1e-4)

    print("KERNEL_OK")
</pallas_src>

<mosaic_0001>
module attributes {stable_mosaic.version = 11 : i64} {
  func.func @mlp1_kernel(%arg0: i32, %arg1: memref<8x900xf32, #tpu.memory_space<vmem>>, %arg2: memref<900x512xbf16, #tpu.memory_space<vmem>>, %arg3: memref<1x512xf32, #tpu.memory_space<vmem>>, %arg4: memref<512x128xbf16, #tpu.memory_space<vmem>>, %arg5: memref<1x128xf32, #tpu.memory_space<vmem>>, %arg6: memref<8x128xf32, #tpu.memory_space<vmem>>) attributes {dimension_semantics = [#tpu.dimension_semantics<parallel>], iteration_bounds = array<i64: 1>, scalar_prefetch = 0 : i64, scratch_operands = 0 : i64, tpu.core_type = #tpu.core_type<tc>, window_params = [{transform_indices = @transform_0, window_bounds = array<i64: 8, 900>}, {pipeline_mode = #tpu.pipeline_mode<synchronous>, transform_indices = @transform_1, window_bounds = array<i64: 900, 512>}, {pipeline_mode = #tpu.pipeline_mode<synchronous>, transform_indices = @transform_2, window_bounds = array<i64: 1, 512>}, {pipeline_mode = #tpu.pipeline_mode<synchronous>, transform_indices = @transform_3, window_bounds = array<i64: 512, 128>}, {pipeline_mode = #tpu.pipeline_mode<synchronous>, transform_indices = @transform_4, window_bounds = array<i64: 1, 128>}, {transform_indices = @transform_5, window_bounds = array<i64: 8, 128>}]} {
    %c0 = arith.constant 0 : index
    %c0_0 = arith.constant 0 : index
    %0 = vector.load %arg1[%c0, %c0_0] : memref<8x900xf32, #tpu.memory_space<vmem>>, vector<8x900xf32>
    %1 = arith.truncf %0 : vector<8x900xf32> to vector<8x900xbf16>
    %c0_1 = arith.constant 0 : index
    %c0_2 = arith.constant 0 : index
    %2 = vector.load %arg2[%c0_1, %c0_2] : memref<900x512xbf16, #tpu.memory_space<vmem>>, vector<900x512xbf16>
    %cst = arith.constant dense<0.000000e+00> : vector<8x512xf32>
    %3 = tpu.matmul %1, %2, %cst {dimension_numbers = #tpu.dot_dimension_numbers<[1], [0], [0], [1], [0, 0, 1, 1], [], []>} : vector<8x900xbf16>, vector<900x512xbf16>, vector<8x512xf32> -> vector<8x512xf32>
    %c0_3 = arith.constant 0 : index
    %c0_4 = arith.constant 0 : index
    %4 = vector.load %arg3[%c0_3, %c0_4] : memref<1x512xf32, #tpu.memory_space<vmem>>, vector<1x512xf32>
    %5 = vector.broadcast %4 : vector<1x512xf32> to vector<8x512xf32>
    %6 = arith.addf %3, %5 : vector<8x512xf32>
    %cst_5 = arith.constant 0.000000e+00 : f32
    %7 = vector.broadcast %cst_5 : f32 to vector<8x512xf32>
    %8 = arith.maximumf %6, %7 : vector<8x512xf32>
    %9 = arith.truncf %8 : vector<8x512xf32> to vector<8x512xbf16>
    %c0_6 = arith.constant 0 : index
    %c0_7 = arith.constant 0 : index
    %10 = vector.load %arg4[%c0_6, %c0_7] : memref<512x128xbf16, #tpu.memory_space<vmem>>, vector<512x128xbf16>
    %cst_8 = arith.constant dense<0.000000e+00> : vector<8x128xf32>
    %11 = tpu.matmul %9, %10, %cst_8 {dimension_numbers = #tpu.dot_dimension_numbers<[1], [0], [0], [1], [0, 0, 1, 1], [], []>} : vector<8x512xbf16>, vector<512x128xbf16>, vector<8x128xf32> -> vector<8x128xf32>
    %c0_9 = arith.constant 0 : index
    %c0_10 = arith.constant 0 : index
    %12 = vector.load %arg5[%c0_9, %c0_10] : memref<1x128xf32, #tpu.memory_space<vmem>>, vector<1x128xf32>
    %13 = vector.broadcast %12 : vector<1x128xf32> to vector<8x128xf32>
    %14 = arith.addf %11, %13 : vector<8x128xf32>
    %cst_11 = arith.constant dense<0xFF800000> : vector<8xf32>
    %15 = vector.multi_reduction <maximumf>, %14, %cst_11 [1] : vector<8x128xf32> to vector<8xf32>
    %16 = vector.shape_cast %15 : vector<8xf32> to vector<8x1xf32>
    %17 = vector.broadcast %16 : vector<8x1xf32> to vector<8x128xf32>
    %18 = arith.subf %14, %17 : vector<8x128xf32>
    %19 = math.exp %18 : vector<8x128xf32>
    %cst_12 = arith.constant dense<0.000000e+00> : vector<8xf32>
    %20 = vector.multi_reduction <add>, %19, %cst_12 [1] : vector<8x128xf32> to vector<8xf32>
    %21 = vector.shape_cast %20 : vector<8xf32> to vector<8x1xf32>
    %22 = math.log %21 : vector<8x1xf32>
    %23 = vector.broadcast %22 : vector<8x1xf32> to vector<8x128xf32>
    %24 = arith.subf %18, %23 : vector<8x128xf32>
    %c0_13 = arith.constant 0 : index
    %c0_14 = arith.constant 0 : index
    %25 = vector.load %arg6[%c0_13, %c0_14] : memref<8x128xf32, #tpu.memory_space<vmem>>, vector<8x128xf32>
    tpu.vector_store %arg6[%c0_13, %c0_14], %24 {strides = array<i32>} : memref<8x128xf32, #tpu.memory_space<vmem>>, vector<8x128xf32>,
    return
  }
  func.func @transform_0(%arg0: i32) -> (i32, i32) {
    %c0_i32 = arith.constant 0 : i32
    %c0_i32_0 = arith.constant 0 : i32
    return %arg0, %c0_i32 : i32, i32
  }
  func.func @transform_1(%arg0: i32) -> (i32, i32) {
    %c0_i32 = arith.constant 0 : i32
    %c0_i32_0 = arith.constant 0 : i32
    %c0_i32_1 = arith.constant 0 : i32
    return %c0_i32, %c0_i32_0 : i32, i32
  }
  func.func @transform_2(%arg0: i32) -> (i32, i32) {
    %c0_i32 = arith.constant 0 : i32
    %c0_i32_0 = arith.constant 0 : i32
    %c0_i32_1 = arith.constant 0 : i32
    return %c0_i32, %c0_i32_0 : i32, i32
  }
  func.func @transform_3(%arg0: i32) -> (i32, i32) {
    %c0_i32 = arith.constant 0 : i32
    %c0_i32_0 = arith.constant 0 : i32
    %c0_i32_1 = arith.constant 0 : i32
    return %c0_i32, %c0_i32_0 : i32, i32
  }
  func.func @transform_4(%arg0: i32) -> (i32, i32) {
    %c0_i32 = arith.constant 0 : i32
    %c0_i32_0 = arith.constant 0 : i32
    %c0_i32_1 = arith.constant 0 : i32
    return %c0_i32, %c0_i32_0 : i32, i32
  }
  func.func @transform_5(%arg0: i32) -> (i32, i32) {
    %c0_i32 = arith.constant 0 : i32
    %c0_i32_0 = arith.constant 0 : i32
    return %arg0, %c0_i32 : i32, i32
  }
}

</mosaic_0001>

<bundles_post_ra>
// kernel: tpu_custom_call.1
= control target key start
LH: loop header
LB: loop body
LE: loop exit
PB: predicated region body
PF: predicated region fallthrough
CT: control target
= control target key end

     0   :  { %10 = vsyncpa [#allocation3], 0  ;;  %s3085_s0 = inlined_call_operand.hbm [shape: f32[8,900], index: 0, kind: input, shape index: {}]   ;;  %s3086_s1 = inlined_call_operand.hbm [shape: bf16[900,512], index: 1, kind: input, shape index: {}]   ;;  %s3087_s2 = inlined_call_operand.vmem [shape: f32[1,512], index: 2, kind: input, shape index: {}]   ;;  %s3088_s3 = inlined_call_operand.hbm [shape: bf16[512,128], index: 3, kind: input, shape index: {}]   ;;  %s3089_s4 = inlined_call_operand.vmem [shape: f32[1,128], index: 4, kind: input, shape index: {}]   ;;  %s3090_s5 = inlined_call_operand.hbm [shape: f32[8,128], index: 5, kind: output, shape index: {}]  }
   0x1   :  { %11 = vsyncpa [#allocation6], 0 }
   0x2   :  { %12 = vsyncpa [#allocation4], 0  ;;  %s2993_s18 = smov [#allocation5]   ;;  %s2899_s22 = scalar_lea.hbm %s3086_s1, 28928 }
   0x3   :  { %s28_s19 = sshll.u32 %s2993_s18, 4  ;;  %p2900_p0 = scmp.ne.s32.totalorder %s3086_s1, %s2899_s22  ;;  %s29_s19 = int_to_ptr.vmem [resolvable:$true] %s28_s19 }
   0x4   :  { %p2903_p1 = scmp.lt.u32.totalorder %s2899_s22, %s3086_s1 }
   0x6   :  { %p2905_p2 = pnand %p2903_p1, %p2900_p0 }
   0x8   :  { %2908 = shalt.err (!%p2905_p2)
}
   0x9   :  { %s2909_s27 = scalar_lea.vmem %s29_s19, 28928  ;;  %p2914_p4 = scmp.lt.s32.totalorder %s29_s19, %s29_s19 }
   0xa   :  { %p2910_p3 = scmp.ne.s32.totalorder %s29_s19, %s2909_s27  ;;  %p2915_p5 = scmp.lt.s32.totalorder %s2909_s27, %s2909_s27 }
   0xc   :  { %p2916_p6 = por %p2915_p5, %p2914_p4 }
   0xe   :  { %p2917_p7 = pnand %p2916_p6, %p2910_p3 }
  0x10   :  { %2920 = shalt.err (!%p2917_p7)
}
  0x11   :  { %s2994_s28 = smov 256   ;;  %s2995_s29 = smov 16  }
  0x12   :  { %34 = dma.hbm_to_vmem [thread:$0]  %s3086_s1, 28928, %s29_s19, [#allocation6], %s2994_s28, %s2994_s28, %s2995_s29  }
  0x13   :  { %s2996_s7 = smov [#allocation2]   ;;  %s2997_s9 = smov [#allocation7]  }
  0x14   :  { %s19_s8 = sshll.u32 %s2996_s7, 4  ;;  %s42_s10 = sshll.u32 %s2997_s9, 4  ;;  %s20_s8 = int_to_ptr.vmem [resolvable:$true] %s19_s8  ;;  %s43_s10 = int_to_ptr.vmem [resolvable:$true] %s42_s10 }
  0x15   :  { %s2921_s13 = scalar_lea.hbm %s3085_s0, 1024 }
  0x16   :  { %p2922_p8 = scmp.ne.s32.totalorder %s3085_s0, %s2921_s13  ;;  %p2925_p9 = scmp.lt.u32.totalorder %s2921_s13, %s3085_s0 }
  0x18   :  { %p2927_p10 = pnand %p2925_p9, %p2922_p8 }
  0x1a   :  { %2930 = shalt.err (!%p2927_p10)
}
  0x1b   :  { %s2931_s1 = scalar_lea.vmem %s20_s8, 1024  ;;  %p2936_p12 = scmp.lt.s32.totalorder %s20_s8, %s20_s8 }
  0x1c   :  { %p2932_p11 = scmp.ne.s32.totalorder %s20_s8, %s2931_s1  ;;  %p2937_p13 = scmp.lt.s32.totalorder %s2931_s1, %s2931_s1 }
  0x1e   :  { %p2938_p0 = por %p2937_p13, %p2936_p12 }
  0x20   :  { %p2939_p1 = pnand %p2938_p0, %p2932_p11 }
  0x22   :  { %2942 = shalt.err (!%p2939_p1)
}
  0x23   :  { %22 = dma.hbm_to_vmem [thread:$0]  %s3085_s0, 1024, %s20_s8, [#allocation3]  }
  0x24   :  { %s2943_s22 = scalar_lea.hbm %s3088_s3, 4096 }
  0x25   :  { %p2944_p2 = scmp.ne.s32.totalorder %s3088_s3, %s2943_s22  ;;  %p2947_p3 = scmp.lt.u32.totalorder %s2943_s22, %s3088_s3 }
  0x27   :  { %p2949_p4 = pnand %p2947_p3, %p2944_p2 }
  0x29   :  { %2952 = shalt.err (!%p2949_p4)
}
  0x2a   :  { %s2953_s27 = scalar_lea.vmem %s43_s10, 4096  ;;  %p2958_p6 = scmp.lt.s32.totalorder %s43_s10, %s43_s10 }
  0x2b   :  { %p2954_p5 = scmp.ne.s32.totalorder %s43_s10, %s2953_s27  ;;  %p2959_p7 = scmp.lt.s32.totalorder %s2953_s27, %s2953_s27 }
  0x2d   :  { %p2960_p8 = por %p2959_p7, %p2958_p6 }
  0x2f   :  { %p2961_p9 = pnand %p2960_p8, %p2954_p5 }
  0x31   :  { %2964 = shalt.err (!%p2961_p9)
}
  0x32   :  { %s2998_s0 = smov 64   ;;  %s2999_s28 = smov 4  }
  0x33   :  { %48 = dma.hbm_to_vmem [thread:$0]  %s3088_s3, 4096, %s43_s10, [#allocation6], %s2998_s0, %s2998_s0, %s2999_s28  }
  0x34   :  { %2987 = dma.done.wait [#allocation3], 1024  }
  0x35   :  { %2988 = vsyncadd [#allocation3], 4294966272 }
  0x36   :  { %2989 = dma.done.wait [#allocation6], 33024  }
  0x37   :  { %2990 = vsyncadd [#allocation6], 4294934272  ;;  %v2523_v0 = vld [vmem:[#allocation5 + $0x4] ss:$16 sps:$4 sm:$0xff]   ;;  %v2525_v1 = vld [vmem:[#allocation5 + $0xc] ss:$16 sps:$4 sm:$0xff]  }
  0x38   :  { %1472 = vmatprep.subr.bf16.mxu0 %v2523_v0  ;;  %v2527_v2 = vld [vmem:[#allocation5] ss:$16 sps:$4 sm:$0xff]   ;;  %v2528_v3 = vld [vmem:[#allocation5 + $0x8] ss:$16 sps:$4 sm:$0xff]   ;;  %1636 = vmatprep.subr.bf16.mxu1 %v2525_v1  ;;  %v2529_v4 = vld [vmem:[#allocation5 + $0x24] ss:$16 sps:$4 sm:$0xff]  }
  0x39   :  { %1473 = vmatpush1.bf16.msra.mxu0 %v2527_v2  ;;  %1637 = vmatpush1.bf16.msra.mxu1 %v2528_v3  ;;  %v2531_v5 = vld [vmem:[#allocation5 + $0x2c] ss:$16 sps:$4 sm:$0xff]   ;;  %v2533_v6 = vld [vmem:[#allocation5 + $0x20] ss:$16 sps:$4 sm:$0xff]   ;;  %v2534_v7 = vld [vmem:[#allocation5 + $0x28] ss:$16 sps:$4 sm:$0xff]  }
  0x3a   :  { %1474 = vmatprep.subr.bf16.mxu0 %v2529_v4  ;;  %1638 = vmatprep.subr.bf16.mxu1 %v2531_v5  ;;  %v2535_v8 = vld [vmem:[#allocation5 + $0x44] ss:$16 sps:$4 sm:$0xff]   ;;  %v2537_v9 = vld [vmem:[#allocation5 + $0x4c] ss:$16 sps:$4 sm:$0xff]   ;;  %v2539_v10 = vld [vmem:[#allocation5 + $0x40] ss:$16 sps:$4 sm:$0xff]  }
  0x3b   :  { %v2540_v11 = vld [vmem:[#allocation5 + $0x48] ss:$16 sps:$4 sm:$0xff]   ;;  %v2541_v12 = vld [vmem:[#allocation5 + $0x64] ss:$16 sps:$4 sm:$0xff]   ;;  %v2543_v13 = vld [vmem:[#allocation5 + $0x6c] ss:$16 sps:$4 sm:$0xff]  }
  0x3c   :  { %v2545_v14 = vld [vmem:[#allocation5 + $0x60] ss:$16 sps:$4 sm:$0xff]   ;;  %v2546_v15 = vld [vmem:[#allocation5 + $0x68] ss:$16 sps:$4 sm:$0xff]   ;;  %v2547_v16 = vld [vmem:[#allocation5 + $0x84] ss:$16 sps:$4 sm:$0xff]  }
  0x3d   :  { %1475 = vmatpush1.bf16.msra.mxu0 %v2533_v6  ;;  %1639 = vmatpush1.bf16.msra.mxu1 %v2534_v7  ;;  %v2549_v17 = vld [vmem:[#allocation5 + $0x8c] ss:$16 sps:$4 sm:$0xff]   ;;  %v2551_v18 = vld [vmem:[#allocation5 + $0x80] ss:$16 sps:$4 sm:$0xff]   ;;  %v2552_v19 = vld [vmem:[#allocation5 + $0x88] ss:$16 sps:$4 sm:$0xff]  }
  0x3e   :  { %1476 = vmatprep.subr.bf16.mxu0 %v2535_v8  ;;  %1640 = vmatprep.subr.bf16.mxu1 %v2537_v9  ;;  %v2553_v20 = vld [vmem:[#allocation5 + $0xa4] ss:$16 sps:$4 sm:$0xff]   ;;  %v2555_v21 = vld [vmem:[#allocation5 + $0xac] ss:$16 sps:$4 sm:$0xff]   ;;  %v2557_v22 = vld [vmem:[#allocation5 + $0xa0] ss:$16 sps:$4 sm:$0xff]  }
  0x3f   :  { %v2558_v23 = vld [vmem:[#allocation5 + $0xa8] ss:$16 sps:$4 sm:$0xff]   ;;  %v2559_v24 = vld [vmem:[#allocation5 + $0xc4] ss:$16 sps:$4 sm:$0xff]   ;;  %v2561_v25 = vld [vmem:[#allocation5 + $0xcc] ss:$16 sps:$4 sm:$0xff]  }
  0x40   :  { %v2563_v26 = vld [vmem:[#allocation5 + $0xc0] ss:$16 sps:$4 sm:$0xff]   ;;  %v2564_v27 = vld [vmem:[#allocation5 + $0xc8] ss:$16 sps:$4 sm:$0xff]   ;;  %v2565_v28 = vld [vmem:[#allocation5 + $0xe4] ss:$16 sps:$4 sm:$0xff]  }
  0x41   :  { %1477 = vmatpush1.bf16.msra.mxu0 %v2539_v10  ;;  %1641 = vmatpush1.bf16.msra.mxu1 %v2540_v11  ;;  %v2567_v29 = vld [vmem:[#allocation5 + $0xec] ss:$16 sps:$4 sm:$0xff]   ;;  %v2569_v30 = vld [vmem:[#allocation5 + $0xe0] ss:$16 sps:$4 sm:$0xff]   ;;  %v2570_v31 = vld [vmem:[#allocation5 + $0xe8] ss:$16 sps:$4 sm:$0xff]  }
  0x42   :  { %1478 = vmatprep.subr.bf16.mxu0 %v2541_v12  ;;  %1642 = vmatprep.subr.bf16.mxu1 %v2543_v13  ;;  %v2571_v32 = vld [vmem:[#allocation5 + $0x104] ss:$16 sps:$4 sm:$0xff]   ;;  %v2573_v33 = vld [vmem:[#allocation5 + $0x10c] ss:$16 sps:$4 sm:$0xff]   ;;  %v2575_v34 = vld [vmem:[#allocation5 + $0x100] ss:$16 sps:$4 sm:$0xff]  }
  0x43   :  { %v2576_v35 = vld [vmem:[#allocation5 + $0x108] ss:$16 sps:$4 sm:$0xff]   ;;  %v2577_v36 = vld [vmem:[#allocation5 + $0x124] ss:$16 sps:$4 sm:$0xff]   ;;  %v2579_v37 = vld [vmem:[#allocation5 + $0x12c] ss:$16 sps:$4 sm:$0xff]  }
  0x44   :  { %v2581_v38 = vld [vmem:[#allocation5 + $0x120] ss:$16 sps:$4 sm:$0xff]   ;;  %v2582_v39 = vld [vmem:[#allocation5 + $0x128] ss:$16 sps:$4 sm:$0xff]   ;;  %v2583_v40 = vld [vmem:[#allocation5 + $0x144] ss:$16 sps:$4 sm:$0xff]  }
  0x45   :  { %1479 = vmatpush1.bf16.msra.mxu0 %v2545_v14  ;;  %1643 = vmatpush1.bf16.msra.mxu1 %v2546_v15  ;;  %v2585_v41 = vld [vmem:[#allocation5 + $0x14c] ss:$16 sps:$4 sm:$0xff]   ;;  %v2587_v42 = vld [vmem:[#allocation5 + $0x140] ss:$16 sps:$4 sm:$0xff]   ;;  %v2588_v43 = vld [vmem:[#allocation5 + $0x148] ss:$16 sps:$4 sm:$0xff]  }
  0x46   :  { %1480 = vmatprep.subr.bf16.mxu0 %v2547_v16  ;;  %1644 = vmatprep.subr.bf16.mxu1 %v2549_v17  ;;  %v2589_v44 = vld [vmem:[#allocation5 + $0x164] ss:$16 sps:$4 sm:$0xff]   ;;  %v2591_v45 = vld [vmem:[#allocation5 + $0x16c] ss:$16 sps:$4 sm:$0xff]   ;;  %v2593_v47 = vld [vmem:[#allocation5 + $0x160] ss:$16 sps:$4 sm:$0xff]  }
  0x47   :  { %v62_v46 = vld [vmem:[#allocation2 + $0x8] sm:$0xff]  ;;  %v2595_v50 = vld [vmem:[#allocation5 + $0x184] ss:$16 sps:$4 sm:$0xff]   ;;  %v2599_v52 = vld [vmem:[#allocation5 + $0x180] ss:$16 sps:$4 sm:$0xff]   ;;  %vm1455_vm0 = vcmask 31744  }
  0x48   :  { %v70_v48 = vpack.c.bf16 %v62_v46, %v62_v46  ;;  %v2594_v49 = vld [vmem:[#allocation5 + $0x168] ss:$16 sps:$4 sm:$0xff]   ;;  %v2597_v51 = vld [vmem:[#allocation5 + $0x18c] ss:$16 sps:$4 sm:$0xff]   ;;  %v2601_v54 = vld [vmem:[#allocation5 + $0x1a4] ss:$16 sps:$4 sm:$0xff]  }
  0x49   :  { %1481 = vmatpush1.bf16.msra.mxu0 %v2551_v18  ;;  %1645 = vmatpush1.bf16.msra.mxu1 %v2552_v19  ;;  %v2600_v53 = vld [vmem:[#allocation5 + $0x188] ss:$16 sps:$4 sm:$0xff]   ;;  %v2603_v55 = vld [vmem:[#allocation5 + $0x1ac] ss:$16 sps:$4 sm:$0xff]   ;;  %v2605_v56 = vld [vmem:[#allocation5 + $0x1a0] ss:$16 sps:$4 sm:$0xff]  }
  0x4a   :  { %1482 = vmatprep.subr.bf16.mxu0 %v2553_v20  ;;  %1646 = vmatprep.subr.bf16.mxu1 %v2555_v21  ;;  %v2606_v57 = vld [vmem:[#allocation5 + $0x1a8] ss:$16 sps:$4 sm:$0xff]   ;;  %v2607_v58 = vld [vmem:[#allocation5 + $0x1c4] ss:$16 sps:$4 sm:$0xff]   ;;  %v2609_v59 = vld [vmem:[#allocation5 + $0x1cc] ss:$16 sps:$4 sm:$0xff]  }
  0x4b   :  { %1504 = vmatprep.mubr.bf16.mxu0 %v70_v48  ;;  %1668 = vmatprep.mubr.bf16.mxu1 %v70_v48  ;;  %v2611_v60 = vld [vmem:[#allocation5 + $0x1c0] ss:$16 sps:$4 sm:$0xff]   ;;  %v2612_v61 = vld [vmem:[#allocation5 + $0x1c8] ss:$16 sps:$4 sm:$0xff]   ;;  %v2613_v62 = vld [vmem:[#allocation5 + $0x1e4] ss:$16 sps:$4 sm:$0xff]  }
  0x4c   :  { %v2615_v63 = vld [vmem:[#allocation5 + $0x1ec] ss:$16 sps:$4 sm:$0xff]   ;;  %v2617_v0 = vld [vmem:[#allocation5 + $0x1e0] ss:$16 sps:$4 sm:$0xff]   ;;  %v2618_v1 = vld [vmem:[#allocation5 + $0x1e8] ss:$16 sps:$4 sm:$0xff]  }
  0x4d   :  { %1483 = vmatpush1.bf16.msra.mxu0 %v2557_v22  ;;  %1647 = vmatpush1.bf16.msra.mxu1 %v2558_v23  ;;  %v61_v2 = vld [vmem:[#allocation2] sm:$0xff]  ;;  %v2624_v4 = vld [vmem:[#allocation5 + $0x20c] ss:$16 sps:$4 sm:$0xff]   ;;  %v2622_v7 = vld [vmem:[#allocation5 + $0x208] ss:$16 sps:$4 sm:$0xff]   ;;  %vm1459_vm1 = vcmask 1041408  }
  0x4e   :  { %1484 = vmatprep.subr.bf16.mxu0 %v2559_v24  ;;  %1648 = vmatprep.subr.bf16.mxu1 %v2561_v25  ;;  %v2621_v3 = vld [vmem:[#allocation5 + $0x204] ss:$16 sps:$4 sm:$0xff]   ;;  %v69_v5 = vpack.c.bf16 %v61_v2, %v61_v2  ;;  %v2619_v6 = vld [vmem:[#allocation5 + $0x200] ss:$16 sps:$4 sm:$0xff]   ;;  %v2630_v9 = vld [vmem:[#allocation5 + $0x22c] ss:$16 sps:$4 sm:$0xff]  }
  0x4f   :  { %v2627_v8 = vld [vmem:[#allocation5 + $0x224] ss:$16 sps:$4 sm:$0xff]   ;;  %v2625_v10 = vld [vmem:[#allocation5 + $0x220] ss:$16 sps:$4 sm:$0xff]   ;;  %v2628_v11 = vld [vmem:[#allocation5 + $0x228] ss:$16 sps:$4 sm:$0xff]  }
  0x50   :  { %v2633_v12 = vld [vmem:[#allocation5 + $0x244] ss:$16 sps:$4 sm:$0xff]   ;;  %v2636_v13 = vld [vmem:[#allocation5 + $0x24c] ss:$16 sps:$4 sm:$0xff]   ;;  %v2631_v14 = vld [vmem:[#allocation5 + $0x240] ss:$16 sps:$4 sm:$0xff]  }
  0x51   :  { %1485 = vmatpush1.bf16.msra.mxu0 %v2563_v26  ;;  %1649 = vmatpush1.bf16.msra.mxu1 %v2564_v27  ;;  %v2634_v15 = vld [vmem:[#allocation5 + $0x248] ss:$16 sps:$4 sm:$0xff]   ;;  %v2639_v16 = vld [vmem:[#allocation5 + $0x264] ss:$16 sps:$4 sm:$0xff]   ;;  %v2642_v17 = vld [vmem:[#allocation5 + $0x26c] ss:$16 sps:$4 sm:$0xff]  }
  0x52   :  { %1486 = vmatprep.subr.bf16.mxu0 %v2565_v28  ;;  %1650 = vmatprep.subr.bf16.mxu1 %v2567_v29  ;;  %v2637_v18 = vld [vmem:[#allocation5 + $0x260] ss:$16 sps:$4 sm:$0xff]   ;;  %v2640_v19 = vld [vmem:[#allocation5 + $0x268] ss:$16 sps:$4 sm:$0xff]   ;;  %v2645_v20 = vld [vmem:[#allocation5 + $0x284] ss:$16 sps:$4 sm:$0xff]  }
  0x53   :  { %v2648_v21 = vld [vmem:[#allocation5 + $0x28c] ss:$16 sps:$4 sm:$0xff]   ;;  %v2643_v22 = vld [vmem:[#allocation5 + $0x280] ss:$16 sps:$4 sm:$0xff]   ;;  %v2646_v23 = vld [vmem:[#allocation5 + $0x288] ss:$16 sps:$4 sm:$0xff]  }
  0x54   :  { %v2651_v24 = vld [vmem:[#allocation5 + $0x2a4] ss:$16 sps:$4 sm:$0xff]   ;;  %v2654_v25 = vld [vmem:[#allocation5 + $0x2ac] ss:$16 sps:$4 sm:$0xff]   ;;  %v2649_v26 = vld [vmem:[#allocation5 + $0x2a0] ss:$16 sps:$4 sm:$0xff]  }
  0x55   :  { %1487 = vmatpush1.bf16.msra.mxu0 %v2569_v30  ;;  %1651 = vmatpush1.bf16.msra.mxu1 %v2570_v31  ;;  %v2652_v27 = vld [vmem:[#allocation5 + $0x2a8] ss:$16 sps:$4 sm:$0xff]   ;;  %v2657_v28 = vld [vmem:[#allocation5 + $0x2c4] ss:$16 sps:$4 sm:$0xff]   ;;  %v2660_v29 = vld [vmem:[#allocation5 + $0x2cc] ss:$16 sps:$4 sm:$0xff]  }
  0x56   :  { %1488 = vmatprep.subr.bf16.mxu0 %v2571_v32  ;;  %1652 = vmatprep.subr.bf16.mxu1 %v2573_v33  ;;  %v64_v30 = vld [vmem:[#allocation2 + $0x18] sm:$0xff]  ;;  %v2655_v31 = vld [vmem:[#allocation5 + $0x2c0] ss:$16 sps:$4 sm:$0xff]   ;;  %v2681_v46 = vld [vmem:[#allocation5 + $0x344] ss:$16 sps:$4 sm:$0xff]  }
  0x57   :  { %v72_v32 = vpack.c.bf16 %v64_v30, %v64_v30  ;;  %v2658_v33 = vld [vmem:[#allocation5 + $0x2c8] ss:$16 sps:$4 sm:$0xff]   ;;  %v2679_v48 = vld [vmem:[#allocation5 + $0x340] ss:$16 sps:$4 sm:$0xff]   ;;  %v2711_v2 = vld [vmem:[#allocation5 + $0x3e4] ss:$16 sps:$4 sm:$0xff]  }
  0x58   :  { %v2747_v30 = vld [vmem:[#allocation5 + $0x4a4] ss:$16 sps:$4 sm:$0xff]  }
  0x59   :  { %1489 = vmatpush1.bf16.msra.mxu0 %v2575_v34  ;;  %1653 = vmatpush1.bf16.msra.mxu1 %v2576_v35  ;;  %v2663_v34 = vld [vmem:[#allocation5 + $0x2e4] ss:$16 sps:$4 sm:$0xff]   ;;  %v2666_v35 = vld [vmem:[#allocation5 + $0x2ec] ss:$16 sps:$4 sm:$0xff]  }
  0x5a   :  { %1490 = vmatprep.subr.bf16.mxu0 %v2577_v36  ;;  %1654 = vmatprep.subr.bf16.mxu1 %v2579_v37  ;;  %v2661_v36 = vld [vmem:[#allocation5 + $0x2e0] ss:$16 sps:$4 sm:$0xff]   ;;  %v2664_v37 = vld [vmem:[#allocation5 + $0x2e8] ss:$16 sps:$4 sm:$0xff]  }
  0x5d   :  { %1491 = vmatpush1.bf16.msra.mxu0 %v2581_v38  ;;  %1655 = vmatpush1.bf16.msra.mxu1 %v2582_v39  ;;  %v2669_v38 = vld [vmem:[#allocation5 + $0x304] ss:$16 sps:$4 sm:$0xff]   ;;  %v2672_v39 = vld [vmem:[#allocation5 + $0x30c] ss:$16 sps:$4 sm:$0xff]  }
  0x5e   :  { %1492 = vmatprep.subr.bf16.mxu0 %v2583_v40  ;;  %1656 = vmatprep.subr.bf16.mxu1 %v2585_v41  ;;  %v2667_v40 = vld [vmem:[#allocation5 + $0x300] ss:$16 sps:$4 sm:$0xff]   ;;  %v2670_v41 = vld [vmem:[#allocation5 + $0x308] ss:$16 sps:$4 sm:$0xff]  }
  0x61   :  { %1493 = vmatpush1.bf16.msra.mxu0 %v2587_v42  ;;  %1657 = vmatpush1.bf16.msra.mxu1 %v2588_v43  ;;  %v2675_v42 = vld [vmem:[#allocation5 + $0x324] ss:$16 sps:$4 sm:$0xff]   ;;  %v2678_v43 = vld [vmem:[#allocation5 + $0x32c] ss:$16 sps:$4 sm:$0xff]  }
  0x62   :  { %1494 = vmatprep.subr.bf16.mxu0 %v2589_v44  ;;  %1658 = vmatprep.subr.bf16.mxu1 %v2591_v45  ;;  %v2673_v44 = vld [vmem:[#allocation5 + $0x320] ss:$16 sps:$4 sm:$0xff]   ;;  %v2676_v45 = vld [vmem:[#allocation5 + $0x328] ss:$16 sps:$4 sm:$0xff]  }
  0x65   :  { %1495 = vmatpush1.bf16.msra.mxu0 %v2593_v47  ;;  %1659 = vmatpush1.bf16.msra.mxu1 %v2594_v49  ;;  %v2684_v47 = vld [vmem:[#allocation5 + $0x34c] ss:$16 sps:$4 sm:$0xff]   ;;  %v2682_v49 = vld [vmem:[#allocation5 + $0x348] ss:$16 sps:$4 sm:$0xff]  }
  0x66   :  { %1496 = vmatprep.subr.bf16.mxu0 %v2595_v50  ;;  %1660 = vmatprep.subr.bf16.mxu1 %v2597_v51  ;;  %v2687_v50 = vld [vmem:[#allocation5 + $0x364] ss:$16 sps:$4 sm:$0xff]   ;;  %v2690_v51 = vld [vmem:[#allocation5 + $0x36c] ss:$16 sps:$4 sm:$0xff]  }
  0x69   :  { %1497 = vmatpush1.bf16.msra.mxu0 %v2599_v52  ;;  %1661 = vmatpush1.bf16.msra.mxu1 %v2600_v53  ;;  %v2685_v52 = vld [vmem:[#allocation5 + $0x360] ss:$16 sps:$4 sm:$0xff]   ;;  %v2688_v53 = vld [vmem:[#allocation5 + $0x368] ss:$16 sps:$4 sm:$0xff]  }
  0x6a   :  { %1498 = vmatprep.subr.bf16.mxu0 %v2601_v54  ;;  %1662 = vmatprep.subr.bf16.mxu1 %v2603_v55  ;;  %v2693_v54 = vld [vmem:[#allocation5 + $0x384] ss:$16 sps:$4 sm:$0xff]   ;;  %v2696_v55 = vld [vmem:[#allocation5 + $0x38c] ss:$16 sps:$4 sm:$0xff]  }
  0x6d   :  { %1499 = vmatpush1.bf16.msra.mxu0 %v2605_v56  ;;  %1663 = vmatpush1.bf16.msra.mxu1 %v2606_v57  ;;  %v2691_v56 = vld [vmem:[#allocation5 + $0x380] ss:$16 sps:$4 sm:$0xff]   ;;  %v2694_v57 = vld [vmem:[#allocation5 + $0x388] ss:$16 sps:$4 sm:$0xff]  }
  0x6e   :  { %1500 = vmatprep.subr.bf16.mxu0 %v2607_v58  ;;  %1664 = vmatprep.subr.bf16.mxu1 %v2609_v59  ;;  %v2699_v58 = vld [vmem:[#allocation5 + $0x3a4] ss:$16 sps:$4 sm:$0xff]   ;;  %v2702_v59 = vld [vmem:[#allocation5 + $0x3ac] ss:$16 sps:$4 sm:$0xff]  }
  0x71   :  { %1501 = vmatpush1.bf16.msra.mxu0 %v2611_v60  ;;  %1665 = vmatpush1.bf16.msra.mxu1 %v2612_v61  ;;  %v2697_v60 = vld [vmem:[#allocation5 + $0x3a0] ss:$16 sps:$4 sm:$0xff]   ;;  %v2700_v61 = vld [vmem:[#allocation5 + $0x3a8] ss:$16 sps:$4 sm:$0xff]  }
  0x72   :  { %1502 = vmatprep.subr.bf16.mxu0 %v2613_v62  ;;  %1666 = vmatprep.subr.bf16.mxu1 %v2615_v63  ;;  %v2705_v62 = vld [vmem:[#allocation5 + $0x3c4] ss:$16 sps:$4 sm:$0xff]   ;;  %v2708_v63 = vld [vmem:[#allocation5 + $0x3cc] ss:$16 sps:$4 sm:$0xff]  }
  0x75   :  { %1503 = vmatpush1.bf16.msra.mxu0 %v2617_v0  ;;  %1667 = vmatpush1.bf16.msra.mxu1 %v2618_v1  ;;  %v2703_v0 = vld [vmem:[#allocation5 + $0x3c0] ss:$16 sps:$4 sm:$0xff]   ;;  %v2706_v1 = vld [vmem:[#allocation5 + $0x3c8] ss:$16 sps:$4 sm:$0xff]  }
  0x76   :  { %1513 = vmatprep.subr.bf16.mxu0 %v2621_v3  ;;  %1677 = vmatprep.subr.bf16.mxu1 %v2624_v4  ;;  %v2714_v3 = vld [vmem:[#allocation5 + $0x3ec] ss:$16 sps:$4 sm:$0xff]   ;;  %v2709_v4 = vld [vmem:[#allocation5 + $0x3e0] ss:$16 sps:$4 sm:$0xff]  }
  0x78   :  { %1505 = vmatmul.mubr.bf16.vlgmr.msra.gmra.mrb[0].mxu0 %v69_v5  ;;  %1669 = vmatmul.mubr.bf16.vlgmr.msra.gmra.mrb[0].mxu1 %v69_v5  ;;  %v2712_v5 = vld [vmem:[#allocation5 + $0x3e8] ss:$16 sps:$4 sm:$0xff]  }
  0x79   :  { %1514 = vmatpush1.bf16.msra.mxu0 %v2619_v6  ;;  %1678 = vmatpush1.bf16.msra.mxu1 %v2622_v7  ;;  %v2717_v6 = vld [vmem:[#allocation5 + $0x404] ss:$16 sps:$4 sm:$0xff]  }
  0x7a   :  { %1515 = vmatprep.subr.bf16.mxu0 %v2627_v8  ;;  %1679 = vmatprep.subr.bf16.mxu1 %v2630_v9  ;;  %v63_v7 = vld [vmem:[#allocation2 + $0x10] sm:$0xff]  ;;  %v2720_v8 = vld [vmem:[#allocation5 + $0x40c] ss:$16 sps:$4 sm:$0xff]  }
  0x7b   :  { %1545 = vmatprep.mubr.bf16.mxu0 %v72_v32  ;;  %1709 = vmatprep.mubr.bf16.mxu1 %v72_v32  ;;  %v2715_v9 = vld [vmem:[#allocation5 + $0x400] ss:$16 sps:$4 sm:$0xff]  }
  0x7c   :  { %v2745_v32 = vld [vmem:[#allocation5 + $0x4a0] ss:$16 sps:$4 sm:$0xff]  }
  0x7d   :  { %1516 = vmatpush1.bf16.msra.mxu0 %v2625_v10  ;;  %1680 = vmatpush1.bf16.msra.mxu1 %v2628_v11  ;;  %v2718_v10 = vld [vmem:[#allocation5 + $0x408] ss:$16 sps:$4 sm:$0xff]   ;;  %v71_v11 = vpack.c.bf16 %v63_v7, %v63_v7  ;;  %v2810_v7 = vld [vmem:[#allocation5 + $0x5ec] ss:$16 sps:$4 sm:$0xff]  }
  0x7e   :  { %1517 = vmatprep.subr.bf16.mxu0 %v2633_v12  ;;  %1681 = vmatprep.subr.bf16.mxu1 %v2636_v13  ;;  %v2723_v12 = vld [vmem:[#allocation5 + $0x424] ss:$16 sps:$4 sm:$0xff]   ;;  %v2726_v13 = vld [vmem:[#allocation5 + $0x42c] ss:$16 sps:$4 sm:$0xff]  }
  0x81   :  { %1518 = vmatpush1.bf16.msra.mxu0 %v2631_v14  ;;  %1682 = vmatpush1.bf16.msra.mxu1 %v2634_v15  ;;  %v66_v14 = vld [vmem:[#allocation2 + $0x28] sm:$0xff] }
  0x82   :  { %1519 = vmatprep.subr.bf16.mxu0 %v2639_v16  ;;  %1683 = vmatprep.subr.bf16.mxu1 %v2642_v17  ;;  %v74_v15 = vpack.c.bf16 %v66_v14, %v66_v14  ;;  %v2721_v16 = vld [vmem:[#allocation5 + $0x420] ss:$16 sps:$4 sm:$0xff]   ;;  %v2724_v17 = vld [vmem:[#allocation5 + $0x428] ss:$16 sps:$4 sm:$0xff]  }
  0x83   :  { %v68_v14 = vld [vmem:[#allocation2 + $0x38] sm:$0xff] }
  0x85   :  { %1520 = vmatpush1.bf16.msra.mxu0 %v2637_v18  ;;  %1684 = vmatpush1.bf16.msra.mxu1 %v2640_v19  ;;  %v2729_v18 = vld [vmem:[#allocation5 + $0x444] ss:$16 sps:$4 sm:$0xff]   ;;  %v2732_v19 = vld [vmem:[#allocation5 + $0x44c] ss:$16 sps:$4 sm:$0xff]  }
  0x86   :  { %1521 = vmatprep.subr.bf16.mxu0 %v2645_v20  ;;  %1685 = vmatprep.subr.bf16.mxu1 %v2648_v21  ;;  %v2727_v20 = vld [vmem:[#allocation5 + $0x440] ss:$16 sps:$4 sm:$0xff]   ;;  %v2730_v21 = vld [vmem:[#allocation5 + $0x448] ss:$16 sps:$4 sm:$0xff]  }
  0x89   :  { %1522 = vmatpush1.bf16.msra.mxu0 %v2643_v22  ;;  %1686 = vmatpush1.bf16.msra.mxu1 %v2646_v23  ;;  %v2735_v22 = vld [vmem:[#allocation5 + $0x464] ss:$16 sps:$4 sm:$0xff]   ;;  %v2738_v23 = vld [vmem:[#allocation5 + $0x46c] ss:$16 sps:$4 sm:$0xff]  }
  0x8a   :  { %1523 = vmatprep.subr.bf16.mxu0 %v2651_v24  ;;  %1687 = vmatprep.subr.bf16.mxu1 %v2654_v25  ;;  %v2733_v24 = vld [vmem:[#allocation5 + $0x460] ss:$16 sps:$4 sm:$0xff]   ;;  %v2736_v25 = vld [vmem:[#allocation5 + $0x468] ss:$16 sps:$4 sm:$0xff]  }
  0x8d   :  { %1524 = vmatpush1.bf16.msra.mxu0 %v2649_v26  ;;  %1688 = vmatpush1.bf16.msra.mxu1 %v2652_v27  ;;  %v2741_v26 = vld [vmem:[#allocation5 + $0x484] ss:$16 sps:$4 sm:$0xff]   ;;  %v2744_v27 = vld [vmem:[#allocation5 + $0x48c] ss:$16 sps:$4 sm:$0xff]  }
  0x8e   :  { %1525 = vmatprep.subr.bf16.mxu0 %v2657_v28  ;;  %1689 = vmatprep.subr.bf16.mxu1 %v2660_v29  ;;  %v2739_v28 = vld [vmem:[#allocation5 + $0x480] ss:$16 sps:$4 sm:$0xff]   ;;  %v2742_v29 = vld [vmem:[#allocation5 + $0x488] ss:$16 sps:$4 sm:$0xff]  }
  0x91   :  { %1526 = vmatpush1.bf16.msra.mxu0 %v2655_v31  ;;  %1690 = vmatpush1.bf16.msra.mxu1 %v2658_v33  ;;  %v2750_v31 = vld [vmem:[#allocation5 + $0x4ac] ss:$16 sps:$4 sm:$0xff]   ;;  %v2748_v33 = vld [vmem:[#allocation5 + $0x4a8] ss:$16 sps:$4 sm:$0xff]  }
  0x92   :  { %1527 = vmatprep.subr.bf16.mxu0 %v2663_v34  ;;  %1691 = vmatprep.subr.bf16.mxu1 %v2666_v35  ;;  %v2753_v34 = vld [vmem:[#allocation5 + $0x4c4] ss:$16 sps:$4 sm:$0xff]   ;;  %v2756_v35 = vld [vmem:[#allocation5 + $0x4cc] ss:$16 sps:$4 sm:$0xff]  }
  0x95   :  { %1528 = vmatpush1.bf16.msra.mxu0 %v2661_v36  ;;  %1692 = vmatpush1.bf16.msra.mxu1 %v2664_v37  ;;  %v2751_v36 = vld [vmem:[#allocation5 + $0x4c0] ss:$16 sps:$4 sm:$0xff]   ;;  %v2754_v37 = vld [vmem:[#allocation5 + $0x4c8] ss:$16 sps:$4 sm:$0xff]  }
  0x96   :  { %1529 = vmatprep.subr.bf16.mxu0 %v2669_v38  ;;  %1693 = vmatprep.subr.bf16.mxu1 %v2672_v39  ;;  %v2759_v38 = vld [vmem:[#allocation5 + $0x4e4] ss:$16 sps:$4 sm:$0xff]   ;;  %v2762_v39 = vld [vmem:[#allocation5 + $0x4ec] ss:$16 sps:$4 sm:$0xff]  }
  0x99   :  { %1530 = vmatpush1.bf16.msra.mxu0 %v2667_v40  ;;  %1694 = vmatpush1.bf16.msra.mxu1 %v2670_v41  ;;  %v2757_v40 = vld [vmem:[#allocation5 + $0x4e0] ss:$16 sps:$4 sm:$0xff]   ;;  %v2760_v41 = vld [vmem:[#allocation5 + $0x4e8] ss:$16 sps:$4 sm:$0xff]  }
  0x9a   :  { %1531 = vmatprep.subr.bf16.mxu0 %v2675_v42  ;;  %1695 = vmatprep.subr.bf16.mxu1 %v2678_v43  ;;  %v2765_v42 = vld [vmem:[#allocation5 + $0x504] ss:$16 sps:$4 sm:$0xff]   ;;  %v2768_v43 = vld [vmem:[#allocation5 + $0x50c] ss:$16 sps:$4 sm:$0xff]  }
  0x9d   :  { %1532 = vmatpush1.bf16.msra.mxu0 %v2673_v44  ;;  %1696 = vmatpush1.bf16.msra.mxu1 %v2676_v45  ;;  %v2763_v44 = vld [vmem:[#allocation5 + $0x500] ss:$16 sps:$4 sm:$0xff]   ;;  %v2766_v45 = vld [vmem:[#allocation5 + $0x508] ss:$16 sps:$4 sm:$0xff]  }
  0x9e   :  { %1533 = vmatprep.subr.bf16.mxu0 %v2681_v46  ;;  %1697 = vmatprep.subr.bf16.mxu1 %v2684_v47  ;;  %v2771_v46 = vld [vmem:[#allocation5 + $0x524] ss:$16 sps:$4 sm:$0xff]   ;;  %v2774_v47 = vld [vmem:[#allocation5 + $0x52c] ss:$16 sps:$4 sm:$0xff]  }
  0xa1   :  { %1534 = vmatpush1.bf16.msra.mxu0 %v2679_v48  ;;  %1698 = vmatpush1.bf16.msra.mxu1 %v2682_v49  ;;  %v2769_v48 = vld [vmem:[#allocation5 + $0x520] ss:$16 sps:$4 sm:$0xff]   ;;  %v2772_v49 = vld [vmem:[#allocation5 + $0x528] ss:$16 sps:$4 sm:$0xff]  }
  0xa2   :  { %1535 = vmatprep.subr.bf16.mxu0 %v2687_v50  ;;  %1699 = vmatprep.subr.bf16.mxu1 %v2690_v51  ;;  %v2777_v50 = vld [vmem:[#allocation5 + $0x544] ss:$16 sps:$4 sm:$0xff]   ;;  %v2780_v51 = vld [vmem:[#allocation5 + $0x54c] ss:$16 sps:$4 sm:$0xff]  }
  0xa5   :  { %1536 = vmatpush1.bf16.msra.mxu0 %v2685_v52  ;;  %1700 = vmatpush1.bf16.msra.mxu1 %v2688_v53  ;;  %v2775_v52 = vld [vmem:[#allocation5 + $0x540] ss:$16 sps:$4 sm:$0xff]   ;;  %v2778_v53 = vld [vmem:[#allocation5 + $0x548] ss:$16 sps:$4 sm:$0xff]  }
  0xa6   :  { %1537 = vmatprep.subr.bf16.mxu0 %v2693_v54  ;;  %1701 = vmatprep.subr.bf16.mxu1 %v2696_v55  ;;  %v2783_v54 = vld [vmem:[#allocation5 + $0x564] ss:$16 sps:$4 sm:$0xff]   ;;  %v2786_v55 = vld [vmem:[#allocation5 + $0x56c] ss:$16 sps:$4 sm:$0xff]  }
  0xa9   :  { %1538 = vmatpush1.bf16.msra.mxu0 %v2691_v56  ;;  %1702 = vmatpush1.bf16.msra.mxu1 %v2694_v57  ;;  %v2781_v56 = vld [vmem:[#allocation5 + $0x560] ss:$16 sps:$4 sm:$0xff]   ;;  %v2784_v57 = vld [vmem:[#allocation5 + $0x568] ss:$16 sps:$4 sm:$0xff]  }
  0xaa   :  { %1539 = vmatprep.subr.bf16.mxu0 %v2699_v58  ;;  %1703 = vmatprep.subr.bf16.mxu1 %v2702_v59  ;;  %v2789_v58 = vld [vmem:[#allocation5 + $0x584] ss:$16 sps:$4 sm:$0xff]   ;;  %v2792_v59 = vld [vmem:[#allocation5 + $0x58c] ss:$16 sps:$4 sm:$0xff]  }
  0xad   :  { %1540 = vmatpush1.bf16.msra.mxu0 %v2697_v60  ;;  %1704 = vmatpush1.bf16.msra.mxu1 %v2700_v61  ;;  %v2787_v60 = vld [vmem:[#allocation5 + $0x580] ss:$16 sps:$4 sm:$0xff]   ;;  %v2790_v61 = vld [vmem:[#allocation5 + $0x588] ss:$16 sps:$4 sm:$0xff]  }
  0xae   :  { %1541 = vmatprep.subr.bf16.mxu0 %v2705_v62  ;;  %1705 = vmatprep.subr.bf16.mxu1 %v2708_v63  ;;  %v2795_v62 = vld [vmem:[#allocation5 + $0x5a4] ss:$16 sps:$4 sm:$0xff]   ;;  %v2798_v63 = vld [vmem:[#allocation5 + $0x5ac] ss:$16 sps:$4 sm:$0xff]  }
  0xb1   :  { %1542 = vmatpush1.bf16.msra.mxu0 %v2703_v0  ;;  %1706 = vmatpush1.bf16.msra.mxu1 %v2706_v1  ;;  %v2793_v0 = vld [vmem:[#allocation5 + $0x5a0] ss:$16 sps:$4 sm:$0xff]   ;;  %v2796_v1 = vld [vmem:[#allocation5 + $0x5a8] ss:$16 sps:$4 sm:$0xff]  }
  0xb2   :  { %1543 = vmatprep.subr.bf16.mxu0 %v2711_v2  ;;  %1707 = vmatprep.subr.bf16.mxu1 %v2714_v3  ;;  %v2801_v2 = vld [vmem:[#allocation5 + $0x5c4] ss:$16 sps:$4 sm:$0xff]   ;;  %v2804_v3 = vld [vmem:[#allocation5 + $0x5cc] ss:$16 sps:$4 sm:$0xff]  }
  0xb5   :  { %1544 = vmatpush1.bf16.msra.mxu0 %v2709_v4  ;;  %1708 = vmatpush1.bf16.msra.mxu1 %v2712_v5  ;;  %v2799_v4 = vld [vmem:[#allocation5 + $0x5c0] ss:$16 sps:$4 sm:$0xff]   ;;  %v2802_v5 = vld [vmem:[#allocation5 + $0x5c8] ss:$16 sps:$4 sm:$0xff]  }
  0xb6   :  { %1554 = vmatprep.subr.bf16.mxu0 %v2717_v6  ;;  %1718 = vmatprep.subr.bf16.mxu1 %v2720_v8  ;;  %v2807_v6 = vld [vmem:[#allocation5 + $0x5e4] ss:$16 sps:$4 sm:$0xff]   ;;  %v2805_v8 = vld [vmem:[#allocation5 + $0x5e0] ss:$16 sps:$4 sm:$0xff]  }
  0xb8   :  { %1546 = vmatmul.mubr.bf16.vlgmr.msra.gmra.mrb[0].mxu0 %v71_v11  ;;  %1710 = vmatmul.mubr.bf16.vlgmr.msra.gmra.mrb[0].mxu1 %v71_v11  ;;  %v2813_v11 = vld [vmem:[#allocation5 + $0x604] ss:$16 sps:$4 sm:$0xff]  }
  0xb9   :  { %1555 = vmatpush1.bf16.msra.mxu0 %v2715_v9  ;;  %1719 = vmatpush1.bf16.msra.mxu1 %v2718_v10  ;;  %v2808_v9 = vld [vmem:[#allocation5 + $0x5e8] ss:$16 sps:$4 sm:$0xff]   ;;  %v65_v10 = vld [vmem:[#allocation2 + $0x20] sm:$0xff] }
  0xba   :  { %1556 = vmatprep.subr.bf16.mxu0 %v2723_v12  ;;  %1720 = vmatprep.subr.bf16.mxu1 %v2726_v13  ;;  %v2816_v12 = vld [vmem:[#allocation5 + $0x60c] ss:$16 sps:$4 sm:$0xff]   ;;  %v73_v13 = vpack.c.bf16 %v65_v10, %v65_v10  ;;  %v2881_v10 = vld [vmem:[#allocation7 + $0x20] sm:$0xff]  }
  0xbb   :  { %1586 = vmatprep.mubr.bf16.mxu0 %v74_v15  ;;  %1750 = vmatprep.mubr.bf16.mxu1 %v74_v15  ;;  %v2811_v15 = vld [vmem:[#allocation5 + $0x600] ss:$16 sps:$4 sm:$0xff]  }
  0xbd   :  { %1557 = vmatpush1.bf16.msra.mxu0 %v2721_v16  ;;  %1721 = vmatpush1.bf16.msra.mxu1 %v2724_v17  ;;  %v2814_v16 = vld [vmem:[#allocation5 + $0x608] ss:$16 sps:$4 sm:$0xff]   ;;  %v2819_v17 = vld [vmem:[#allocation5 + $0x624] ss:$16 sps:$4 sm:$0xff]  }
  0xbe   :  { %1558 = vmatprep.subr.bf16.mxu0 %v2729_v18  ;;  %1722 = vmatprep.subr.bf16.mxu1 %v2732_v19  ;;  %v2822_v18 = vld [vmem:[#allocation5 + $0x62c] ss:$16 sps:$4 sm:$0xff]   ;;  %v76_v19 = vpack.c.bf16 %v68_v14, %v68_v14 }
  0xbf   :  { %v2885_v14 = vld [vmem:[#allocation7 + $0x28] sm:$0xff]  }
  0xc1   :  { %1559 = vmatpush1.bf16.msra.mxu0 %v2727_v20  ;;  %1723 = vmatpush1.bf16.msra.mxu1 %v2730_v21  ;;  %v2817_v20 = vld [vmem:[#allocation5 + $0x620] ss:$16 sps:$4 sm:$0xff]   ;;  %v2820_v21 = vld [vmem:[#allocation5 + $0x628] ss:$16 sps:$4 sm:$0xff]  }
  0xc2   :  { %1560 = vmatprep.subr.bf16.mxu0 %v2735_v22  ;;  %1724 = vmatprep.subr.bf16.mxu1 %v2738_v23  ;;  %v2825_v22 = vld [vmem:[#allocation5 + $0x644] ss:$16 sps:$4 sm:$0xff]   ;;  %v2828_v23 = vld [vmem:[#allocation5 + $0x64c] ss:$16 sps:$4 sm:$0xff]  }
  0xc5   :  { %1561 = vmatpush1.bf16.msra.mxu0 %v2733_v24  ;;  %1725 = vmatpush1.bf16.msra.mxu1 %v2736_v25  ;;  %v2823_v24 = vld [vmem:[#allocation5 + $0x640] ss:$16 sps:$4 sm:$0xff]   ;;  %v2826_v25 = vld [vmem:[#allocation5 + $0x648] ss:$16 sps:$4 sm:$0xff]  }
  0xc6   :  { %1562 = vmatprep.subr.bf16.mxu0 %v2741_v26  ;;  %1726 = vmatprep.subr.bf16.mxu1 %v2744_v27  ;;  %v2831_v26 = vld [vmem:[#allocation5 + $0x664] ss:$16 sps:$4 sm:$0xff]   ;;  %v2834_v27 = vld [vmem:[#allocation5 + $0x66c] ss:$16 sps:$4 sm:$0xff]  }
  0xc9   :  { %1563 = vmatpush1.bf16.msra.mxu0 %v2739_v28  ;;  %1727 = vmatpush1.bf16.msra.mxu1 %v2742_v29  ;;  %v2829_v28 = vld [vmem:[#allocation5 + $0x660] ss:$16 sps:$4 sm:$0xff]   ;;  %v2832_v29 = vld [vmem:[#allocation5 + $0x668] ss:$16 sps:$4 sm:$0xff]  }
  0xca   :  { %1564 = vmatprep.subr.bf16.mxu0 %v2747_v30  ;;  %1728 = vmatprep.subr.bf16.mxu1 %v2750_v31  ;;  %v2837_v30 = vld [vmem:[#allocation5 + $0x684] ss:$16 sps:$4 sm:$0xff]   ;;  %v2840_v31 = vld [vmem:[#allocation5 + $0x68c] ss:$16 sps:$4 sm:$0xff]  }
  0xcd   :  { %1565 = vmatpush1.bf16.msra.mxu0 %v2745_v32  ;;  %1729 = vmatpush1.bf16.msra.mxu1 %v2748_v33  ;;  %v2835_v32 = vld [vmem:[#allocation5 + $0x680] ss:$16 sps:$4 sm:$0xff]   ;;  %v2838_v33 = vld [vmem:[#allocation5 + $0x688] ss:$16 sps:$4 sm:$0xff]  }
  0xce   :  { %1566 = vmatprep.subr.bf16.mxu0 %v2753_v34  ;;  %1730 = vmatprep.subr.bf16.mxu1 %v2756_v35  ;;  %v2843_v34 = vld [vmem:[#allocation5 + $0x6a4] ss:$16 sps:$4 sm:$0xff]   ;;  %v2846_v35 = vld [vmem:[#allocation5 + $0x6ac] ss:$16 sps:$4 sm:$0xff]  }
  0xd1   :  { %1567 = vmatpush1.bf16.msra.mxu0 %v2751_v36  ;;  %1731 = vmatpush1.bf16.msra.mxu1 %v2754_v37  ;;  %v2841_v36 = vld [vmem:[#allocation5 + $0x6a0] ss:$16 sps:$4 sm:$0xff]   ;;  %v2844_v37 = vld [vmem:[#allocation5 + $0x6a8] ss:$16 sps:$4 sm:$0xff]  }
  0xd2   :  { %1568 = vmatprep.subr.bf16.mxu0 %v2759_v38  ;;  %1732 = vmatprep.subr.bf16.mxu1 %v2762_v39  ;;  %v2849_v38 = vld [vmem:[#allocation5 + $0x6c4] ss:$16 sps:$4 sm:$0xff]   ;;  %v2852_v39 = vld [vmem:[#allocation5 + $0x6cc] ss:$16 sps:$4 sm:$0xff]  }
  0xd5   :  { %1569 = vmatpush1.bf16.msra.mxu0 %v2757_v40  ;;  %1733 = vmatpush1.bf16.msra.mxu1 %v2760_v41  ;;  %v2847_v40 = vld [vmem:[#allocation5 + $0x6c0] ss:$16 sps:$4 sm:$0xff]   ;;  %v2850_v41 = vld [vmem:[#allocation5 + $0x6c8] ss:$16 sps:$4 sm:$0xff]  }
  0xd6   :  { %1570 = vmatprep.subr.bf16.mxu0 %v2765_v42  ;;  %1734 = vmatprep.subr.bf16.mxu1 %v2768_v43  ;;  %v2855_v42 = vld [vmem:[#allocation5 + $0x6e4] ss:$16 sps:$4 sm:$0xff]   ;;  %v2858_v43 = vld [vmem:[#allocation5 + $0x6ec] ss:$16 sps:$4 sm:$0xff]  }
  0xd9   :  { %1571 = vmatpush1.bf16.msra.mxu0 %v2763_v44  ;;  %1735 = vmatpush1.bf16.msra.mxu1 %v2766_v45  ;;  %v301_v44 = vld [vmem:[#allocation5 + $0x700] sm:$0x33]  ;;  %v302_v45 = vld [vmem:[#allocation5 + $0x708] sm:$0x33] }
  0xda   :  { %1572 = vmatprep.subr.bf16.mxu0 %v2771_v46  ;;  %1736 = vmatprep.subr.bf16.mxu1 %v2774_v47  ;;  %v2853_v46 = vld [vmem:[#allocation5 + $0x6e0] ss:$16 sps:$4 sm:$0xff]   ;;  %v2856_v47 = vld [vmem:[#allocation5 + $0x6e8] ss:$16 sps:$4 sm:$0xff]  }
  0xdd   :  { %1573 = vmatpush1.bf16.msra.mxu0 %v2769_v48  ;;  %1737 = vmatpush1.bf16.msra.mxu1 %v2772_v49  ;;  %v2403_v48 = vcombine.high %v301_v44, %v301_v44  ;;  %v2405_v49 = vcombine.high %v302_v45, %v302_v45 }
  0xde   :  { %1574 = vmatprep.subr.bf16.mxu0 %v2777_v50  ;;  %1738 = vmatprep.subr.bf16.mxu1 %v2780_v51  ;;  %v2402_v50 = vcombine.low %v301_v44, %v301_v44  ;;  %v2404_v51 = vcombine.low %v302_v45, %v302_v45 }
  0xe1   :  { %1575 = vmatpush1.bf16.msra.mxu0 %v2775_v52  ;;  %1739 = vmatpush1.bf16.msra.mxu1 %v2778_v53  ;;  %v67_v52 = vld [vmem:[#allocation2 + $0x30] sm:$0xff]  ;;  %v1461_v53 = vsel %vm1459_vm1, %v2402_v50, 0 }
  0xe2   :  { %1576 = vmatprep.subr.bf16.mxu0 %v2783_v54  ;;  %1740 = vmatprep.subr.bf16.mxu1 %v2786_v55  ;;  %v1467_v54 = vsel %vm1459_vm1, %v2404_v51, 0  ;;  %v2863_v55 = vld [vmem:[#allocation7 + $0x40] sm:$0xff]  }
  0xe5   :  { %1577 = vmatpush1.bf16.msra.mxu0 %v2781_v56  ;;  %1741 = vmatpush1.bf16.msra.mxu1 %v2784_v57  ;;  %v2864_v56 = vld [vmem:[#allocation7 + $0xc0] sm:$0xff]   ;;  %v75_v57 = vpack.c.bf16 %v67_v52, %v67_v52 }
  0xe6   :  { %1578 = vmatprep.subr.bf16.mxu0 %v2789_v58  ;;  %1742 = vmatprep.subr.bf16.mxu1 %v2792_v59  ;;  %v2865_v58 = vld [vmem:[#allocation7] sm:$0xff]  }
  0xe7   :  { %v2866_v59 = vld [vmem:[#allocation7 + $0x80] sm:$0xff]  }
  0xe9   :  { %1579 = vmatpush1.bf16.msra.mxu0 %v2787_v60  ;;  %1743 = vmatpush1.bf16.msra.mxu1 %v2790_v61  ;;  %v2867_v60 = vld [vmem:[#allocation7 + $0x48] sm:$0xff]  }
  0xea   :  { %1580 = vmatprep.subr.bf16.mxu0 %v2795_v62  ;;  %1744 = vmatprep.subr.bf16.mxu1 %v2798_v63  ;;  %v2868_v61 = vld [vmem:[#allocation7 + $0xc8] sm:$0xff]  }
  0xeb   :  { %v2869_v62 = vld [vmem:[#allocation7 + $0x8] sm:$0xff]  }
  0xec   :  { %v2870_v63 = vld [vmem:[#allocation7 + $0x88] sm:$0xff]  }
  0xed   :  { %1581 = vmatpush1.bf16.msra.mxu0 %v2793_v0  ;;  %1745 = vmatpush1.bf16.msra.mxu1 %v2796_v1  ;;  %v2871_v0 = vld [vmem:[#allocation7 + $0x50] sm:$0xff]  }
  0xee   :  { %1582 = vmatprep.subr.bf16.mxu0 %v2801_v2  ;;  %1746 = vmatprep.subr.bf16.mxu1 %v2804_v3  ;;  %v2872_v1 = vld [vmem:[#allocation7 + $0xd0] sm:$0xff]  }
  0xef   :  { %v2873_v2 = vld [vmem:[#allocation7 + $0x10] sm:$0xff]  }
  0xf0   :  { %v2874_v3 = vld [vmem:[#allocation7 + $0x90] sm:$0xff]  }
  0xf1   :  { %1583 = vmatpush1.bf16.msra.mxu0 %v2799_v4  ;;  %1747 = vmatpush1.bf16.msra.mxu1 %v2802_v5  ;;  %v2875_v4 = vld [vmem:[#allocation7 + $0x58] sm:$0xff]  }
  0xf2   :  { %1584 = vmatprep.subr.bf16.mxu0 %v2807_v6  ;;  %1748 = vmatprep.subr.bf16.mxu1 %v2810_v7  ;;  %v2876_v5 = vld [vmem:[#allocation7 + $0xd8] sm:$0xff]  }
  0xf3   :  { %v2877_v6 = vld [vmem:[#allocation7 + $0x18] sm:$0xff]  }
  0xf4   :  { %v2878_v7 = vld [vmem:[#allocation7 + $0x98] sm:$0xff]  }
  0xf5   :  { %1585 = vmatpush1.bf16.msra.mxu0 %v2805_v8  ;;  %1749 = vmatpush1.bf16.msra.mxu1 %v2808_v9  ;;  %v2879_v8 = vld [vmem:[#allocation7 + $0x60] sm:$0xff]  }
  0xf6   :  { %1595 = vmatprep.subr.bf16.mxu0 %v2813_v11  ;;  %1759 = vmatprep.subr.bf16.mxu1 %v2816_v12  ;;  %v2880_v9 = vld [vmem:[#allocation7 + $0xe0] sm:$0xff]   ;;  %v2883_v12 = vld [vmem:[#allocation7 + $0x68] sm:$0xff]  }
  0xf7   :  { %v2882_v11 = vld [vmem:[#allocation7 + $0xa0] sm:$0xff]  }
  0xf8   :  { %1587 = vmatmul.mubr.bf16.vlgmr.msra.gmra.mrb[0].mxu0 %v73_v13  ;;  %1751 = vmatmul.mubr.bf16.vlgmr.msra.gmra.mrb[0].mxu1 %v73_v13  ;;  %v2884_v13 = vld [vmem:[#allocation7 + $0xe8] sm:$0xff]  }
  0xf9   :  { %1596 = vmatpush1.bf16.msra.mxu0 %v2811_v15  ;;  %1760 = vmatpush1.bf16.msra.mxu1 %v2814_v16  ;;  %v2886_v15 = vld [vmem:[#allocation7 + $0xa8] sm:$0xff]   ;;  %v2887_v16 = vld [vmem:[#allocation7 + $0x70] sm:$0xff]  }
  0xfa   :  { %1597 = vmatprep.subr.bf16.mxu0 %v2819_v17  ;;  %1761 = vmatprep.subr.bf16.mxu1 %v2822_v18  ;;  %v2888_v17 = vld [vmem:[#allocation7 + $0xf0] sm:$0xff]  }
  0xfb   :  { %2407 = vmatprep.mubr.msk.bf16.mxu0 %vm1455_vm0, %v76_v19  ;;  %2409 = vmatprep.mubr.msk.bf16.mxu1 %vm1455_vm0, %v76_v19  ;;  %v2889_v18 = vld [vmem:[#allocation7 + $0x30] sm:$0xff]  }
  0xfc   :  { %v2890_v19 = vld [vmem:[#allocation7 + $0xb0] sm:$0xff]  }
  0xfd   :  { %1598 = vmatpush1.bf16.msra.mxu0 %v2817_v20  ;;  %1762 = vmatpush1.bf16.msra.mxu1 %v2820_v21  ;;  %v2891_v20 = vld [vmem:[#allocation7 + $0x78] sm:$0xff]  }
  0xfe   :  { %1599 = vmatprep.subr.bf16.mxu0 %v2825_v22  ;;  %1763 = vmatprep.subr.bf16.mxu1 %v2828_v23  ;;  %v2892_v21 = vld [vmem:[#allocation7 + $0xf8] sm:$0xff]  }
  0xff   :  { %v2893_v22 = vld [vmem:[#allocation7 + $0x38] sm:$0xff]  }
 0x100   :  { %v2894_v23 = vld [vmem:[#allocation7 + $0xb8] sm:$0xff]  }
 0x101   :  { %1600 = vmatpush1.bf16.msra.mxu0 %v2823_v24  ;;  %1764 = vmatpush1.bf16.msra.mxu1 %v2826_v25  ;;  %v305_v24 = vlaneseq }
 0x102   :  { %1601 = vmatprep.subr.bf16.mxu0 %v2831_v26  ;;  %1765 = vmatprep.subr.bf16.mxu1 %v2834_v27 }
 0x103   :  { %v306_v25 = vshrl.u32 %v305_v24, 7 }
 0x105   :  { %1602 = vmatpush1.bf16.msra.mxu0 %v2829_v28  ;;  %1766 = vmatpush1.bf16.msra.mxu1 %v2832_v29  ;;  %v307_v26 = vsub.s32 0, %v306_v25  ;;  %v315_v27 = vsub.s32 2, %v306_v25  ;;  %v303_v28 = vld [vmem:[%s3087_s2] sm:$0xf]  ;;  %v311_v29 = vsub.s32 1, %v306_v25 }
 0x106   :  { %1603 = vmatprep.subr.bf16.mxu0 %v2837_v30  ;;  %1767 = vmatprep.subr.bf16.mxu1 %v2840_v31  ;;  %v319_v30 = vsub.s32 3, %v306_v25 }
 0x107   :  { %v308_v31 = vrot.slane %v303_v28, %v307_v26 }
 0x109   :  { %1604 = vmatpush1.bf16.msra.mxu0 %v2835_v32  ;;  %1768 = vmatpush1.bf16.msra.mxu1 %v2838_v33  ;;  %v316_v32 = vrot.slane %v303_v28, %v315_v27  ;;  %v312_v33 = vrot.slane %v303_v28, %v311_v29 }
 0x10a   :  { %1605 = vmatprep.subr.bf16.mxu0 %v2843_v34  ;;  %1769 = vmatprep.subr.bf16.mxu1 %v2846_v35  ;;  %v320_v34 = vrot.slane %v303_v28, %v319_v30 }
 0x10d   :  { %1606 = vmatpush1.bf16.msra.mxu0 %v2841_v36  ;;  %1770 = vmatpush1.bf16.msra.mxu1 %v2844_v37 }
 0x10e   :  { %1607 = vmatprep.subr.bf16.mxu0 %v2849_v38  ;;  %1771 = vmatprep.subr.bf16.mxu1 %v2852_v39 }
 0x111   :  { %1608 = vmatpush1.bf16.msra.mxu0 %v2847_v40  ;;  %1772 = vmatpush1.bf16.msra.mxu1 %v2850_v41 }
 0x112   :  { %1609 = vmatprep.subr.bf16.mxu0 %v2855_v42  ;;  %1773 = vmatprep.subr.bf16.mxu1 %v2858_v43 }
 0x115   :  { %1610 = vmatpush1.bf16.msra.mxu0 %v2853_v46  ;;  %1774 = vmatpush1.bf16.msra.mxu1 %v2856_v47 }
 0x116   :  { %2406 = vmatprep.subr.msk.bf16.mxu0 %vm1459_vm1, %v2403_v48  ;;  %2408 = vmatprep.subr.msk.bf16.mxu1 %vm1459_vm1, %v2405_v49 }
 0x119   :  { %1612 = vmatpush1.bf16.msra.mxu0 %v1461_v53  ;;  %1776 = vmatpush1.bf16.msra.mxu1 %v1467_v54 }
 0x11a   :  { %2443 = vmatprep.subr.bf16.mxu0 %v2863_v55  ;;  %2465 = vmatprep.subr.bf16.mxu1 %v2864_v56 }
 0x11c   :  { %1628 = vmatmul.mubr.bf16.vlgmr.msra.gmra.mrb[0].mxu0 %v75_v57  ;;  %1792 = vmatmul.mubr.bf16.vlgmr.msra.gmra.mrb[0].mxu1 %v75_v57  ;;  %v2410_v57 = vld [vmem:[%s3089_s4] ss:$0 sm:$0xff]  ;;  %s3000_s4 = smov [#allocation8]  }
 0x11d   :  { %2444 = vmatpush3.bf16.msra.mxu0 %v2865_v58  ;;  %2466 = vmatpush3.bf16.msra.mxu1 %v2866_v59  ;;  %s2168_s8 = sshll.u32 %s3000_s4, 4  ;;  %s2169_s8 = int_to_ptr.vmem [resolvable:$true] %s2168_s8 }
 0x11e   :  { %2445 = vmatprep.subr.bf16.mxu0 %v2867_v60  ;;  %2467 = vmatprep.subr.bf16.mxu1 %v2868_v61  ;;  %s2965_s9 = scalar_lea.vmem %s2169_s8, 128  ;;  %p2970_p11 = scmp.lt.s32.totalorder %s2169_s8, %s2169_s8 }
 0x11f   :  { %p2966_p10 = scmp.ne.s32.totalorder %s2169_s8, %s2965_s9  ;;  %p2971_p12 = scmp.lt.s32.totalorder %s2965_s9, %s2965_s9 }
 0x121   :  { %2446 = vmatpush3.bf16.msra.mxu0 %v2869_v62  ;;  %2468 = vmatpush3.bf16.msra.mxu1 %v2870_v63  ;;  %p2972_p13 = por %p2971_p12, %p2970_p11 }
 0x122   :  { %2447 = vmatprep.subr.bf16.mxu0 %v2871_v0  ;;  %2469 = vmatprep.subr.bf16.mxu1 %v2872_v1 }
 0x123   :  { %p2973_p0 = pnand %p2972_p13, %p2966_p10 }
 0x125   :  { %2448 = vmatpush3.bf16.msra.mxu0 %v2873_v2  ;;  %2470 = vmatpush3.bf16.msra.mxu1 %v2874_v3 }
 0x126   :  { %2449 = vmatprep.subr.bf16.mxu0 %v2875_v4  ;;  %2471 = vmatprep.subr.bf16.mxu1 %v2876_v5 }
 0x129   :  { %2450 = vmatpush3.bf16.msra.mxu0 %v2877_v6  ;;  %2472 = vmatpush3.bf16.msra.mxu1 %v2878_v7 }
 0x12a   :  { %2451 = vmatprep.subr.bf16.mxu0 %v2879_v8  ;;  %2473 = vmatprep.subr.bf16.mxu1 %v2880_v9 }
 0x12d   :  { %2452 = vmatpush3.bf16.msra.mxu0 %v2881_v10  ;;  %2474 = vmatpush3.bf16.msra.mxu1 %v2882_v11 }
 0x12e   :  { %2453 = vmatprep.subr.bf16.mxu0 %v2883_v12  ;;  %2475 = vmatprep.subr.bf16.mxu1 %v2884_v13 }
 0x131   :  { %2454 = vmatpush3.bf16.msra.mxu0 %v2885_v14  ;;  %2476 = vmatpush3.bf16.msra.mxu1 %v2886_v15 }
 0x132   :  { %2455 = vmatprep.subr.bf16.mxu0 %v2887_v16  ;;  %2477 = vmatprep.subr.bf16.mxu1 %v2888_v17 }
 0x135   :  { %2456 = vmatpush3.bf16.msra.mxu0 %v2889_v18  ;;  %2478 = vmatpush3.bf16.msra.mxu1 %v2890_v19 }
 0x136   :  { %2457 = vmatprep.subr.bf16.mxu0 %v2891_v20  ;;  %2479 = vmatprep.subr.bf16.mxu1 %v2892_v21 }
 0x139   :  { %2458 = vmatpush3.bf16.msra.mxu0 %v2893_v22  ;;  %2480 = vmatpush3.bf16.msra.mxu1 %v2894_v23 }
 0x1ef   :  { %v1629_v35 = vpop.f32.mrb[0].mxu0  ;;  %v1793_v36 = vpop.f32.mrb[0].mxu1 }
 0x1f0   :  { %v2487_v37 = vadd.f32 %v1629_v35, %v308_v31  ;;  %v2489_v38 = vadd.f32 %v1793_v36, %v316_v32  ;;  %v1631_v39 = vpop.f32.mrb[1].mxu0  ;;  %v1795_v40 = vpop.f32.mrb[1].mxu1 }
 0x1f1   :  { %v2488_v41 = vadd.f32 %v1631_v39, %v312_v33  ;;  %v2490_v42 = vadd.f32 %v1795_v40, %v320_v34  ;;  %v1633_v43 = vpop.f32.mrb[2].mxu0  ;;  %v1797_v44 = vpop.f32.mrb[2].mxu1 }
 0x1f2   :  { %v1800_v45 = vmax.f32 %v2487_v37, 0.0  ;;  %v1802_v46 = vmax.f32 %v2489_v38, 0.0  ;;  %v1634_v47 = vpop.f32.mrb[3].mxu0  ;;  %v1798_v48 = vpop.f32.mrb[3].mxu1 }
 0x1f3   :  { %v1801_v49 = vmax.f32 %v2488_v41, 0.0  ;;  %v1803_v50 = vmax.f32 %v2490_v42, 0.0 }
 0x1f4   :  { %v1804_v53 = vpack.c.bf16 %v1800_v45, %v1800_v45  ;;  %v1806_v54 = vpack.c.bf16 %v1802_v46, %v1802_v46 }
 0x1f5   :  { %v1805_v51 = vpack.c.bf16 %v1801_v49, %v1801_v49  ;;  %v1807_v52 = vpack.c.bf16 %v1803_v50, %v1803_v50 }
 0x1f7   :  { %2103 = vmatprep.mubr.bf16.mxu0 %v1805_v51  ;;  %2143 = vmatprep.mubr.bf16.mxu1 %v1807_v52 }
 0x1f8   :  { %2104 = vmatmul.mubr.bf16.vlgmr.msra.gmra.mrb[4].mxu0 %v1804_v53  ;;  %2144 = vmatmul.mubr.bf16.vlgmr.msra.gmra.mrb[4].mxu1 %v1806_v54 }
 0x2cb   :  { %v2459_v55 = vpop.f32.mrb[4].mxu0  ;;  %v2481_v56 = vpop.f32.mrb[4].mxu1 }
 0x2cc   :  { %v2460_v58 = vpop.f32.mrb[5].mxu0  ;;  %v2482_v59 = vpop.f32.mrb[5].mxu1 }
 0x2cd   :  { %v2461_v60 = vadd.f32 %v2460_v58, %v2459_v55  ;;  %v2483_v61 = vadd.f32 %v2482_v59, %v2481_v56  ;;  %v2462_v62 = vpop.f32.mrb[6].mxu0  ;;  %v2484_v63 = vpop.f32.mrb[6].mxu1 }
 0x2ce   :  { %v2463_v0 = vpop.f32.mrb[7].mxu0  ;;  %v2485_v1 = vpop.f32.mrb[7].mxu1 }
 0x2cf   :  { %v2106_v2 = vadd.f32 %v2461_v60, %v2410_v57 }
 0x2d1   :  { %v2146_v3 = vadd.f32 %v2483_v61, %v2106_v2 }
 0x2d3   :  { %2151 = vmax.xlane.f32.xlu0 %v2146_v3 }
 0x360   :  { %v2152_v4 = vpop.xlane.xlu0 %2151 }
 0x361   :  { %v2153_v5 = vsub.f32 %v2146_v3, %v2152_v4 }
 0x363   :  { %v2154_v6 = vmul.f32 1.442695, %v2153_v5 }
 0x365   :  { %2895 = vpow2.f32 %v2154_v6 }
 0x36f   :  { %v2896_v7 = vpop.eup %2895 }
 0x370   :  { %2156 = vadd.xlane.f32.xlu0 %v2896_v7 }
 0x3fd   :  { %v2157_v8 = vpop.xlane.xlu0 %2156 }
 0x3fe   :  { %2897 = vlog2.f32 %v2157_v8 }
 0x408   :  { %v2898_v9 = vpop.eup %2897 }
 0x409   :  { %v2159_v10 = vmul.f32 0.6931472, %v2898_v9 }
 0x40b   :  { %v2160_v11 = vsub.f32 %v2153_v5, %v2159_v10 }
 0x40d   :  { %2161 = vst [vmem:[#allocation8] sm:$0xff] %v2160_v11 }
 0x40e   :  { %2976 = shalt.err (!%p2973_p0)
}
 0x40f   :  { %s2977_s12 = scalar_lea.hbm %s3090_s5, 128 }
 0x410   :  { %p2978_p1 = scmp.ne.s32.totalorder %s3090_s5, %s2977_s12  ;;  %p2981_p2 = scmp.lt.u32.totalorder %s2977_s12, %s3090_s5 }
 0x412   :  { %p2983_p3 = pnand %p2981_p2, %p2978_p1 }
 0x414   :  { %2986 = shalt.err (!%p2983_p3)
}
 0x415   :  { %2171 = dma.vmem_to_hbm [thread:$0]  %s2169_s8, 128, %s3090_s5, [#allocation4]  }
 0x416   :  { %2991 = dma.done.wait [#allocation4], 128  }
 0x417   :  { %2992 = vsyncadd [#allocation4], 4294967168 }
 0x418   :  { %2175 = vsyncpa [#allocation3], 1 }
 0x419   :  { %2176 = vsyncpa [#allocation6], 1 }
 0x41a   :  { %2177 = vsyncpa [#allocation4], 1 }

</bundles_post_ra>
